<compile_context>
chip_gen: v5e
topology: v5e:2x2
jax: 0.10.0
libtpu: 0.0.40
codegen_flags: <defaults>
</compile_context>

<pallas_src>
import functools

import jax
import jax.numpy as jnp
from jax import lax
from jax.experimental import pallas as pl
from jax.experimental.pallas import tpu as pltpu


def _round_up(x, m):
    return (x + m - 1) // m * m


def _pick_row_tile(H, W):
    """Largest divisor of H with TH*W >= ~512 when possible (MXU occupancy)."""
    target = min(H, max(8, -(-512 // max(W, 1))))
    best = 1
    for d in range(1, H + 1):
        if H % d == 0 and d <= target:
            best = d
    if best < min(8, H):            # awkward (e.g. prime) H: take one full tile
        best = H
    return best


def _conv3x3_relu_kernel(x_ref, w_ref, b_ref, o_ref, *, TH, W, K_p, Cout_p, Cout):
    # x_ref: (1, TH, W, K_p)   im2col'd bf16 input row tile (lane-dense)
    # w_ref: (K_p, Cout_p)     im2col'd bf16 weights (resident across the grid)
    # b_ref: (1, Cout_p)       f32 bias
    # o_ref: (1, TH, W, Cout)  exact-size output row tile
    patch = x_ref[...].reshape(TH * W, K_p)                 # leading merge, lanes unchanged
    acc = jnp.dot(patch, w_ref[...],
                  preferred_element_type=jnp.float32)       # ONE MXU matmul, K = K_p
    acc = jnp.maximum(acc + b_ref[...], 0.0)                 # f32 bias + ReLU epilogue
    acc = acc.reshape(1, TH, W, Cout_p)[..., :Cout]          # drop padded output lanes
    o_ref[...] = acc.astype(o_ref.dtype)


def conv_block(x_nchw, weight, bias, *, row_tile=None, compute_dtype=jnp.bfloat16):
    """ConvBlock forward: Conv2d(kernel_size=3, padding=1) + ReLU.

    x_nchw: (N, Cin, H, W)   weight: (Cout, Cin, 3, 3)   bias: (Cout,)
    returns (N, Cout, H, W) in x_nchw.dtype (bf16 operands, f32 accumulate).
    """
    N, Cin, H, W = x_nchw.shape
    Cout = weight.shape[0]
    out_dtype = x_nchw.dtype

    if row_tile is not None and H % row_tile == 0:
        TH = row_tile
    else:
        TH = _pick_row_tile(H, W)

    K = 9 * Cin                      # full 3x3 im2col contraction depth
    K_p = _round_up(K, 128)          # lane-dense K
    Cout_p = _round_up(Cout, 128)    # lane-dense matmul columns (output stays exact)

    # ---- fused preprocessing: NCHW->NHWC, halo pad, full 3x3 im2col, lane pad, bf16 ----
    x = jnp.transpose(x_nchw.astype(compute_dtype), (0, 2, 3, 1))            # (N,H,W,Cin)
    x = jnp.pad(x, ((0, 0), (1, 1), (1, 1), (0, 0)))                         # (N,H+2,W+2,Cin)
    x = jnp.concatenate(
        [x[:, kh:kh + H, kw:kw + W, :] for kh in range(3) for kw in range(3)],
        axis=-1)                                                             # (N,H,W,9*Cin)
    x = jnp.pad(x, ((0, 0), (0, 0), (0, 0), (0, K_p - K)))                   # (N,H,W,K_p)

    # weights OIHW -> (kh, kw, ci, co) -> (9*Cin, Cout) -> lane pad -> bf16
    w = jnp.transpose(weight, (2, 3, 1, 0)).reshape(K, Cout)
    w = jnp.pad(w, ((0, K_p - K), (0, Cout_p - Cout))).astype(compute_dtype)
    b = jnp.pad(bias.astype(jnp.float32), (0, Cout_p - Cout)).reshape(1, Cout_p)

    # ---- VMEM budget: double-buffered streamed tiles, generation-aware cap ----
    x_blk = TH * W * K_p * jnp.dtype(compute_dtype).itemsize
    o_blk = TH * W * Cout * jnp.dtype(out_dtype).itemsize
    w_blk = K_p * Cout_p * jnp.dtype(compute_dtype).itemsize
    interm = TH * W * (K_p + Cout_p) * 4                     # f32 intermediates
    need = 2 * (x_blk + o_blk) + w_blk + Cout_p * 4 + interm + (1 << 20)
    try:
        phys = getattr(pltpu.get_tpu_info(), "vmem_capacity_bytes", None)
    except Exception:
        phys = None
    cap = int((phys or (64 << 20)) * 3 // 4)                 # ~25% headroom of physical VMEM
    vmem_limit = int(max(16 << 20, min(cap, 2 * need)))

    kernel = functools.partial(_conv3x3_relu_kernel,
                               TH=TH, W=W, K_p=K_p, Cout_p=Cout_p, Cout=Cout)

    out_nhwc = pl.pallas_call(
        kernel,
        out_shape=jax.ShapeDtypeStruct((N, H, W, Cout), out_dtype),
        grid_spec=pltpu.PrefetchScalarGridSpec(
            num_scalar_prefetch=0,
            grid=(N, H // TH),
            in_specs=[
                # Streamed (no-halo) input row tiles; double-buffered by the pipeline.
                pl.BlockSpec((1, TH, W, K_p), lambda n, h: (n, h, 0, 0)),
                # Small im2col'd weight block, resident across all grid steps.
                pl.BlockSpec((K_p, Cout_p), lambda n, h: (0, 0)),
                pl.BlockSpec((1, Cout_p), lambda n, h: (0, 0)),
            ],
            out_specs=pl.BlockSpec((1, TH, W, Cout), lambda n, h: (n, h, 0, 0)),
        ),
        compiler_params=pltpu.CompilerParams(
            dimension_semantics=("parallel", "parallel"),
            vmem_limit_bytes=vmem_limit,
        ),
    )(x, w, b)

    # Exact-size NHWC -> PyTorch NCHW (single transpose, no crop, no padded re-read).
    return jnp.transpose(out_nhwc, (0, 3, 1, 2))


def _reference(x_nchw, weight, bias, compute_dtype=jnp.bfloat16):
    # Reference with identically-rounded (bf16) operands and f32 accumulation,
    # matching the kernel's numerics.
    xr = x_nchw.astype(compute_dtype).astype(jnp.float32)
    wr = weight.astype(compute_dtype).astype(jnp.float32)
    y = lax.conv_general_dilated(
        xr, wr,
        window_strides=(1, 1),
        padding=((1, 1), (1, 1)),
        dimension_numbers=("NCHW", "OIHW", "NCHW"),
        preferred_element_type=jnp.float32,
        precision=lax.Precision.HIGHEST,
    )
    y = y + bias.astype(jnp.float32).reshape(1, -1, 1, 1)
    return jnp.maximum(y, 0.0).astype(x_nchw.dtype)


if __name__ == "__main__":
    key = jax.random.PRNGKey(0)
    k_x, k_w, k_b = jax.random.split(key, 3)

    N, Cin, Cout, H, W = 2, 4, 8, 16, 16

    x = jax.random.normal(k_x, (N, Cin, H, W), dtype=jnp.float32)
    # Deterministic synthetic parameter init (PyTorch-style uniform fan-in bound).
    fan_in = Cin * 3 * 3
    bound = 1.0 / (fan_in ** 0.5)
    weight = jax.random.uniform(k_w, (Cout, Cin, 3, 3), jnp.float32, -bound, bound)
    bias = jax.random.uniform(k_b, (Cout,), jnp.float32, -bound, bound)

    conv_fn = jax.jit(conv_block)           # fuses the preprocessing into one XLA pass
    out = jax.block_until_ready(conv_fn(x, weight, bias))

    ref = _reference(x, weight, bias)
    assert out.shape == (N, Cout, H, W), out.shape
    max_err = float(jnp.max(jnp.abs(out - ref)))
    assert max_err < 1e-3, max_err

    print("KERNEL_OK")
</pallas_src>

<mosaic_0001>
module attributes {stable_mosaic.version = 11 : i64} {
  func.func @_conv3x3_relu_kernel(%arg0: i32, %arg1: i32, %arg2: memref<1x16x16x128xbf16, #tpu.memory_space<vmem>>, %arg3: memref<128x128xbf16, #tpu.memory_space<vmem>>, %arg4: memref<1x128xf32, #tpu.memory_space<vmem>>, %arg5: memref<1x16x16x8xf32, #tpu.memory_space<vmem>>) attributes {dimension_semantics = [#tpu.dimension_semantics<parallel>, #tpu.dimension_semantics<parallel>], iteration_bounds = array<i64: 2, 1>, scalar_prefetch = 0 : i64, scratch_operands = 0 : i64, tpu.core_type = #tpu.core_type<tc>, window_params = [{transform_indices = @transform_0, window_bounds = array<i64: 1, 16, 16, 128>}, {pipeline_mode = #tpu.pipeline_mode<synchronous>, transform_indices = @transform_1, window_bounds = array<i64: 128, 128>}, {pipeline_mode = #tpu.pipeline_mode<synchronous>, transform_indices = @transform_2, window_bounds = array<i64: 1, 128>}, {transform_indices = @transform_3, window_bounds = array<i64: 1, 16, 16, 8>}]} {
    %c0 = arith.constant 0 : index
    %c0_0 = arith.constant 0 : index
    %c0_1 = arith.constant 0 : index
    %c0_2 = arith.constant 0 : index
    %0 = vector.load %arg2[%c0, %c0_0, %c0_1, %c0_2] : memref<1x16x16x128xbf16, #tpu.memory_space<vmem>>, vector<1x16x16x128xbf16>
    %1 = vector.shape_cast %0 : vector<1x16x16x128xbf16> to vector<256x128xbf16>
    %c0_3 = arith.constant 0 : index
    %c0_4 = arith.constant 0 : index
    %2 = vector.load %arg3[%c0_3, %c0_4] : memref<128x128xbf16, #tpu.memory_space<vmem>>, vector<128x128xbf16>
    %cst = arith.constant dense<0.000000e+00> : vector<256x128xf32>
    %3 = tpu.matmul %1, %2, %cst {dimension_numbers = #tpu.dot_dimension_numbers<[1], [0], [0], [1], [0, 0, 1, 1], [], []>} : vector<256x128xbf16>, vector<128x128xbf16>, vector<256x128xf32> -> vector<256x128xf32>
    %c0_5 = arith.constant 0 : index
    %c0_6 = arith.constant 0 : index
    %4 = vector.load %arg4[%c0_5, %c0_6] : memref<1x128xf32, #tpu.memory_space<vmem>>, vector<1x128xf32>
    %5 = vector.broadcast %4 : vector<1x128xf32> to vector<256x128xf32>
    %6 = arith.addf %3, %5 : vector<256x128xf32>
    %cst_7 = arith.constant 0.000000e+00 : f32
    %7 = vector.broadcast %cst_7 : f32 to vector<256x128xf32>
    %8 = arith.maximumf %6, %7 : vector<256x128xf32>
    %9 = vector.shape_cast %8 : vector<256x128xf32> to vector<1x16x16x128xf32>
    %10 = vector.extract_strided_slice %9 {offsets = [0, 0, 0, 0], sizes = [1, 16, 16, 8], strides = [1, 1, 1, 1]} : vector<1x16x16x128xf32> to vector<1x16x16x8xf32>
    %c0_8 = arith.constant 0 : index
    %c0_9 = arith.constant 0 : index
    %c0_10 = arith.constant 0 : index
    %c0_11 = arith.constant 0 : index
    %11 = vector.load %arg5[%c0_8, %c0_9, %c0_10, %c0_11] : memref<1x16x16x8xf32, #tpu.memory_space<vmem>>, vector<1x16x16x8xf32>
    tpu.vector_store %arg5[%c0_8, %c0_9, %c0_10, %c0_11], %10 {strides = array<i32>} : memref<1x16x16x8xf32, #tpu.memory_space<vmem>>, vector<1x16x16x8xf32>,
    return
  }
  func.func @transform_0(%arg0: i32, %arg1: i32) -> (i32, i32, i32, i32) {
    %c0_i32 = arith.constant 0 : i32
    %c0_i32_0 = arith.constant 0 : i32
    %c0_i32_1 = arith.constant 0 : i32
    return %arg0, %arg1, %c0_i32, %c0_i32_0 : i32, i32, i32, i32
  }
  func.func @transform_1(%arg0: i32, %arg1: i32) -> (i32, i32) {
    %c0_i32 = arith.constant 0 : i32
    %c0_i32_0 = arith.constant 0 : i32
    %c0_i32_1 = arith.constant 0 : i32
    return %c0_i32, %c0_i32_0 : i32, i32
  }
  func.func @transform_2(%arg0: i32, %arg1: i32) -> (i32, i32) {
    %c0_i32 = arith.constant 0 : i32
    %c0_i32_0 = arith.constant 0 : i32
    %c0_i32_1 = arith.constant 0 : i32
    return %c0_i32, %c0_i32_0 : i32, i32
  }
  func.func @transform_3(%arg0: i32, %arg1: i32) -> (i32, i32, i32, i32) {
    %c0_i32 = arith.constant 0 : i32
    %c0_i32_0 = arith.constant 0 : i32
    %c0_i32_1 = arith.constant 0 : i32
    return %arg0, %arg1, %c0_i32, %c0_i32_0 : i32, i32, i32, i32
  }
}

</mosaic_0001>

<bundles_post_ra>
// kernel: conv_block.1
= control target key start
LH: loop header
LB: loop body
LE: loop exit
PB: predicated region body
PF: predicated region fallthrough
CT: control target
= control target key end

     0   :  { %s887_s12 = smov 0   ;;  %s889_s13 = smov 0   ;;  %s1073_s0 = inlined_call_operand.vmem [shape: bf16[2,16,16,128], index: 0, kind: input, shape index: {}]   ;;  %s1074_s1 = inlined_call_operand.vmem [shape: bf16[128,128], index: 1, kind: input, shape index: {}]   ;;  %s1075_s2 = inlined_call_operand.vmem [shape: f32[1,128], index: 2, kind: input, shape index: {}]   ;;  %s1076_s3 = inlined_call_operand.vmem [shape: f32[2,16,16,8], index: 3, kind: output, shape index: {}]  }
   0x1   :  { %s891_s14 = smov 0  }
   0x2 LB: > { %s25_s15 = sadd.s32 1, %s861_s13  ;;  %p665_p0 = scmp.ge.s32.totalorder %s865_s14, 1  ;;  %s865_s14 = sphi %s891_s14, %s13_s14   ;;  %s861_s13 = sphi %s889_s13, %s1078_s13   ;;  %s857_s12 = sphi %s887_s12, %s1077_s12  }
   0x3   : > { %p27_p1 = scmp.ge.s32.totalorder %s25_s15, 2  ;;  %p159_p2 = scmp.lt.s32.totalorder %s865_s14, 3 }
   0x5   : > { %s1080_s15 = smov (%p27_p1, %s25_s15), 0  ;;  %p160_p3 = pnand %p665_p0, %p159_p2 }
   0x6   : > { %p194_p4 = scmp.lt.s32.totalorder (!%p160_p3), %s857_s12, 1 }
   0x7   : > { %163 = sbr.rel (%p160_p3) target bundleno = 239 (0xef), region = 32 }
   0xc   : > { %v793_v0 = vld [vmem:[%s1074_s1 + $0x38] sm:$0xff]  ;;  %v792_v1 = vld [vmem:[%s1074_s1 + $0x30] sm:$0xff]  ;;  %v791_v2 = vld [vmem:[%s1074_s1 + $0x28] sm:$0xff]  ;;  %s1082_s12 = smov (!%p194_p4, %s857_s12), 1  ;;  %vm532_vm0 = vcmask 64512  }
   0xd   : > { %411 = vmatpush.bf16.msra.mxu0 %v793_v0  ;;  %794 = vmatpush.bf16.msra.mxu1 %v793_v0  ;;  %v790_v3 = vld [vmem:[%s1074_s1 + $0x20] sm:$0xff]  ;;  %v789_v4 = vld [vmem:[%s1074_s1 + $0x18] sm:$0xff]  ;;  %v788_v5 = vld [vmem:[%s1074_s1 + $0x10] sm:$0xff]  ;;  %s768_s30 = sshll.u32 %s1082_s12, 7  ;;  %s769_s11 = sshll.u32 %s1082_s12, 8 }
   0xe   : > { %795 = vmatpush.bf16.msra.mxu2 %v793_v0  ;;  %796 = vmatpush.bf16.msra.mxu3 %v793_v0  ;;  %v787_v6 = vld [vmem:[%s1074_s1 + $0x8] sm:$0xff]  ;;  %v786_v7 = vld [vmem:[%s1074_s1] sm:$0xff]  ;;  %s939_s8 = scalar_lea.vmem %s1073_s0, %s768_s30  ;;  %s968_s18 = scalar_lea.vmem %s1076_s3, %s769_s11 }
   0xf   : > { %v770_v8 = vld [vmem:[%s939_s8] sm:$0xff]  ;;  %v771_v12 = vld [vmem:[%s939_s8 + $0x8] sm:$0xff]  ;;  %v772_v16 = vld [vmem:[%s939_s8 + $0x10] sm:$0xff] }
  0x10   : > { %v774_v9 = vld [vmem:[%s939_s8 + $0x20] sm:$0xff]  ;;  %v775_v13 = vld [vmem:[%s939_s8 + $0x28] sm:$0xff]  ;;  %v776_v17 = vld [vmem:[%s939_s8 + $0x30] sm:$0xff] }
  0x11   : > { %412 = vmatpush.bf16.msra.mxu0 %v792_v1  ;;  %797 = vmatpush.bf16.msra.mxu1 %v792_v1  ;;  %v778_v10 = vld [vmem:[%s939_s8 + $0x40] sm:$0xff]  ;;  %v779_v14 = vld [vmem:[%s939_s8 + $0x48] sm:$0xff]  ;;  %v780_v18 = vld [vmem:[%s939_s8 + $0x50] sm:$0xff] }
  0x12   : > { %798 = vmatpush.bf16.msra.mxu2 %v792_v1  ;;  %799 = vmatpush.bf16.msra.mxu3 %v792_v1  ;;  %v782_v11 = vld [vmem:[%s939_s8 + $0x60] sm:$0xff]  ;;  %v783_v15 = vld [vmem:[%s939_s8 + $0x68] sm:$0xff]  ;;  %v784_v19 = vld [vmem:[%s939_s8 + $0x70] sm:$0xff] }
  0x13   : > { %v773_v20 = vld [vmem:[%s939_s8 + $0x18] sm:$0xff]  ;;  %v960_v24 = vld [vmem:[%s1075_s2] ss:$0 sm:$0xff] }
  0x14   : > { %v777_v21 = vld [vmem:[%s939_s8 + $0x38] sm:$0xff] }
  0x15   : > { %413 = vmatpush.bf16.msra.mxu0 %v791_v2  ;;  %800 = vmatpush.bf16.msra.mxu1 %v791_v2  ;;  %v781_v22 = vld [vmem:[%s939_s8 + $0x58] sm:$0xff] }
  0x16   : > { %801 = vmatpush.bf16.msra.mxu2 %v791_v2  ;;  %802 = vmatpush.bf16.msra.mxu3 %v791_v2  ;;  %v785_v23 = vld [vmem:[%s939_s8 + $0x78] sm:$0xff] }
  0x19   : > { %414 = vmatpush.bf16.msra.mxu0 %v790_v3  ;;  %803 = vmatpush.bf16.msra.mxu1 %v790_v3 }
  0x1a   : > { %804 = vmatpush.bf16.msra.mxu2 %v790_v3  ;;  %805 = vmatpush.bf16.msra.mxu3 %v790_v3 }
  0x1d   : > { %415 = vmatpush.bf16.msra.mxu0 %v789_v4  ;;  %806 = vmatpush.bf16.msra.mxu1 %v789_v4 }
  0x1e   : > { %807 = vmatpush.bf16.msra.mxu2 %v789_v4  ;;  %808 = vmatpush.bf16.msra.mxu3 %v789_v4 }
  0x21   : > { %416 = vmatpush.bf16.msra.mxu0 %v788_v5  ;;  %809 = vmatpush.bf16.msra.mxu1 %v788_v5 }
  0x22   : > { %810 = vmatpush.bf16.msra.mxu2 %v788_v5  ;;  %811 = vmatpush.bf16.msra.mxu3 %v788_v5 }
  0x25   : > { %417 = vmatpush.bf16.msra.mxu0 %v787_v6  ;;  %812 = vmatpush.bf16.msra.mxu1 %v787_v6 }
  0x26   : > { %813 = vmatpush.bf16.msra.mxu2 %v787_v6  ;;  %814 = vmatpush.bf16.msra.mxu3 %v787_v6 }
  0x29   : > { %418 = vmatpush.bf16.msra.mxu0 %v786_v7  ;;  %815 = vmatpush.bf16.msra.mxu1 %v786_v7 }
  0x2a   : > { %816 = vmatpush.bf16.msra.mxu2 %v786_v7  ;;  %817 = vmatpush.bf16.msra.mxu3 %v786_v7 }
  0x2c   : > { %419 = vmatmul.bf16.vlgmr.msra.gmra.mxu0 %v770_v8  ;;  %439 = vmatmul.bf16.vlgmr.msra.gmra.mxu1 %v774_v9 }
  0x2d   : > { %459 = vmatmul.bf16.vlgmr.msra.gmra.mxu2 %v778_v10  ;;  %479 = vmatmul.bf16.vlgmr.msra.gmra.mxu3 %v782_v11 }
  0x3c   : > { %424 = vmatmul.bf16.gmra.mxu0 %v771_v12  ;;  %444 = vmatmul.bf16.gmra.mxu1 %v775_v13 }
  0x3d   : > { %464 = vmatmul.bf16.gmra.mxu2 %v779_v14  ;;  %484 = vmatmul.bf16.gmra.mxu3 %v783_v15 }
  0x4c   : > { %429 = vmatmul.bf16.gmra.mxu0 %v772_v16  ;;  %449 = vmatmul.bf16.gmra.mxu1 %v776_v17 }
  0x4d   : > { %469 = vmatmul.bf16.gmra.mxu2 %v780_v18  ;;  %489 = vmatmul.bf16.gmra.mxu3 %v784_v19 }
  0x5c   : > { %434 = vmatmul.bf16.gmra.mxu0 %v773_v20  ;;  %454 = vmatmul.bf16.gmra.mxu1 %v777_v21 }
  0x5d   : > { %474 = vmatmul.bf16.gmra.mxu2 %v781_v22  ;;  %494 = vmatmul.bf16.gmra.mxu3 %v785_v23 }
  0xa9   : > { %v420_v25 = vpop.f32.mrf.mxu0  ;;  %v440_v26 = vpop.f32.mrf.mxu1 }
  0xaa   : > { %v421_v27 = vadd.f32 %v960_v24, %v420_v25  ;;  %v441_v28 = vadd.f32 %v960_v24, %v440_v26 }
  0xac   : > { %v500_v29 = vmax.f32 %v421_v27, 0.0  ;;  %v508_v30 = vmax.f32 %v441_v28, 0.0 }
  0xae   : > { %533 = vst.msk [vmem:[%s968_s18] sm:$0xff] %vm532_vm0, %v500_v29 }
  0xaf   : > { %541 = vst.msk [vmem:[%s968_s18 + $0x40] sm:$0xff] %vm532_vm0, %v508_v30 }
  0xb0   : > { %v460_v31 = vpop.f32.mrf.mxu2  ;;  %v480_v32 = vpop.f32.mrf.mxu3 }
  0xb1   : > { %v461_v33 = vadd.f32 %v960_v24, %v460_v31  ;;  %v481_v34 = vadd.f32 %v960_v24, %v480_v32  ;;  %v422_v35 = vpop.f32.mrf.mxu0  ;;  %v442_v36 = vpop.f32.mrf.mxu1 }
  0xb2   : > { %v423_v37 = vadd.f32 %v960_v24, %v422_v35  ;;  %v443_v38 = vadd.f32 %v960_v24, %v442_v36 }
  0xb3   : > { %v516_v39 = vmax.f32 %v461_v33, 0.0  ;;  %v524_v40 = vmax.f32 %v481_v34, 0.0 }
  0xb4   : > { %v501_v41 = vmax.f32 %v423_v37, 0.0  ;;  %v509_v42 = vmax.f32 %v443_v38, 0.0 }
  0xb5   : > { %549 = vst.msk [vmem:[%s968_s18 + $0x80] sm:$0xff] %vm532_vm0, %v516_v39 }
  0xb6   : > { %557 = vst.msk [vmem:[%s968_s18 + $0xc0] sm:$0xff] %vm532_vm0, %v524_v40 }
  0xb7   : > { %534 = vst.msk [vmem:[%s968_s18 + $0x8] sm:$0xff] %vm532_vm0, %v501_v41 }
  0xb8   : > { %542 = vst.msk [vmem:[%s968_s18 + $0x48] sm:$0xff] %vm532_vm0, %v509_v42  ;;  %v462_v43 = vpop.f32.mrf.mxu2  ;;  %v482_v44 = vpop.f32.mrf.mxu3 }
  0xb9   : > { %v463_v45 = vadd.f32 %v960_v24, %v462_v43  ;;  %v483_v46 = vadd.f32 %v960_v24, %v482_v44  ;;  %v425_v47 = vpop.f32.mrf.mxu0  ;;  %v445_v48 = vpop.f32.mrf.mxu1 }
  0xba   : > { %v426_v49 = vadd.f32 %v960_v24, %v425_v47  ;;  %v446_v50 = vadd.f32 %v960_v24, %v445_v48 }
  0xbb   : > { %v517_v51 = vmax.f32 %v463_v45, 0.0  ;;  %v525_v52 = vmax.f32 %v483_v46, 0.0 }
  0xbc   : > { %v502_v53 = vmax.f32 %v426_v49, 0.0  ;;  %v510_v54 = vmax.f32 %v446_v50, 0.0 }
  0xbd   : > { %550 = vst.msk [vmem:[%s968_s18 + $0x88] sm:$0xff] %vm532_vm0, %v517_v51 }
  0xbe   : > { %558 = vst.msk [vmem:[%s968_s18 + $0xc8] sm:$0xff] %vm532_vm0, %v525_v52 }
  0xbf   : > { %535 = vst.msk [vmem:[%s968_s18 + $0x10] sm:$0xff] %vm532_vm0, %v502_v53 }
  0xc0   : > { %543 = vst.msk [vmem:[%s968_s18 + $0x50] sm:$0xff] %vm532_vm0, %v510_v54  ;;  %v465_v55 = vpop.f32.mrf.mxu2  ;;  %v485_v56 = vpop.f32.mrf.mxu3 }
  0xc1   : > { %v466_v57 = vadd.f32 %v960_v24, %v465_v55  ;;  %v486_v58 = vadd.f32 %v960_v24, %v485_v56  ;;  %v427_v59 = vpop.f32.mrf.mxu0  ;;  %v447_v60 = vpop.f32.mrf.mxu1 }
  0xc2   : > { %v428_v61 = vadd.f32 %v960_v24, %v427_v59  ;;  %v448_v62 = vadd.f32 %v960_v24, %v447_v60 }
  0xc3   : > { %v518_v63 = vmax.f32 %v466_v57, 0.0  ;;  %v526_v0 = vmax.f32 %v486_v58, 0.0 }
  0xc4   : > { %v503_v1 = vmax.f32 %v428_v61, 0.0  ;;  %v511_v2 = vmax.f32 %v448_v62, 0.0 }
  0xc5   : > { %551 = vst.msk [vmem:[%s968_s18 + $0x90] sm:$0xff] %vm532_vm0, %v518_v63 }
  0xc6   : > { %559 = vst.msk [vmem:[%s968_s18 + $0xd0] sm:$0xff] %vm532_vm0, %v526_v0 }
  0xc7   : > { %536 = vst.msk [vmem:[%s968_s18 + $0x18] sm:$0xff] %vm532_vm0, %v503_v1 }
  0xc8   : > { %544 = vst.msk [vmem:[%s968_s18 + $0x58] sm:$0xff] %vm532_vm0, %v511_v2  ;;  %v467_v3 = vpop.f32.mrf.mxu2  ;;  %v487_v4 = vpop.f32.mrf.mxu3 }
  0xc9   : > { %v468_v5 = vadd.f32 %v960_v24, %v467_v3  ;;  %v488_v6 = vadd.f32 %v960_v24, %v487_v4  ;;  %v430_v7 = vpop.f32.mrf.mxu0  ;;  %v450_v8 = vpop.f32.mrf.mxu1 }
  0xca   : > { %v431_v9 = vadd.f32 %v960_v24, %v430_v7  ;;  %v451_v10 = vadd.f32 %v960_v24, %v450_v8 }
  0xcb   : > { %v519_v11 = vmax.f32 %v468_v5, 0.0  ;;  %v527_v12 = vmax.f32 %v488_v6, 0.0 }
  0xcc   : > { %v504_v13 = vmax.f32 %v431_v9, 0.0  ;;  %v512_v14 = vmax.f32 %v451_v10, 0.0 }
  0xcd   : > { %552 = vst.msk [vmem:[%s968_s18 + $0x98] sm:$0xff] %vm532_vm0, %v519_v11 }
  0xce   : > { %560 = vst.msk [vmem:[%s968_s18 + $0xd8] sm:$0xff] %vm532_vm0, %v527_v12 }
  0xcf   : > { %537 = vst.msk [vmem:[%s968_s18 + $0x20] sm:$0xff] %vm532_vm0, %v504_v13 }
  0xd0   : > { %545 = vst.msk [vmem:[%s968_s18 + $0x60] sm:$0xff] %vm532_vm0, %v512_v14  ;;  %v470_v15 = vpop.f32.mrf.mxu2  ;;  %v490_v16 = vpop.f32.mrf.mxu3 }
  0xd1   : > { %v471_v17 = vadd.f32 %v960_v24, %v470_v15  ;;  %v491_v18 = vadd.f32 %v960_v24, %v490_v16  ;;  %v432_v19 = vpop.f32.mrf.mxu0  ;;  %v452_v20 = vpop.f32.mrf.mxu1 }
  0xd2   : > { %v433_v21 = vadd.f32 %v960_v24, %v432_v19  ;;  %v453_v22 = vadd.f32 %v960_v24, %v452_v20 }
  0xd3   : > { %v520_v23 = vmax.f32 %v471_v17, 0.0  ;;  %v528_v25 = vmax.f32 %v491_v18, 0.0 }
  0xd4   : > { %v505_v26 = vmax.f32 %v433_v21, 0.0  ;;  %v513_v27 = vmax.f32 %v453_v22, 0.0 }
  0xd5   : > { %553 = vst.msk [vmem:[%s968_s18 + $0xa0] sm:$0xff] %vm532_vm0, %v520_v23 }
  0xd6   : > { %561 = vst.msk [vmem:[%s968_s18 + $0xe0] sm:$0xff] %vm532_vm0, %v528_v25 }
  0xd7   : > { %538 = vst.msk [vmem:[%s968_s18 + $0x28] sm:$0xff] %vm532_vm0, %v505_v26 }
  0xd8   : > { %546 = vst.msk [vmem:[%s968_s18 + $0x68] sm:$0xff] %vm532_vm0, %v513_v27  ;;  %v472_v28 = vpop.f32.mrf.mxu2  ;;  %v492_v29 = vpop.f32.mrf.mxu3 }
  0xd9   : > { %v473_v30 = vadd.f32 %v960_v24, %v472_v28  ;;  %v493_v31 = vadd.f32 %v960_v24, %v492_v29  ;;  %v435_v32 = vpop.f32.mrf.mxu0  ;;  %v455_v33 = vpop.f32.mrf.mxu1 }
  0xda   : > { %v436_v34 = vadd.f32 %v960_v24, %v435_v32  ;;  %v456_v35 = vadd.f32 %v960_v24, %v455_v33 }
  0xdb   : > { %v521_v36 = vmax.f32 %v473_v30, 0.0  ;;  %v529_v37 = vmax.f32 %v493_v31, 0.0 }
  0xdc   : > { %v506_v38 = vmax.f32 %v436_v34, 0.0  ;;  %v514_v39 = vmax.f32 %v456_v35, 0.0 }
  0xdd   : > { %554 = vst.msk [vmem:[%s968_s18 + $0xa8] sm:$0xff] %vm532_vm0, %v521_v36 }
  0xde   : > { %562 = vst.msk [vmem:[%s968_s18 + $0xe8] sm:$0xff] %vm532_vm0, %v529_v37 }
  0xdf   : > { %539 = vst.msk [vmem:[%s968_s18 + $0x30] sm:$0xff] %vm532_vm0, %v506_v38 }
  0xe0   : > { %547 = vst.msk [vmem:[%s968_s18 + $0x70] sm:$0xff] %vm532_vm0, %v514_v39  ;;  %v475_v40 = vpop.f32.mrf.mxu2  ;;  %v495_v41 = vpop.f32.mrf.mxu3 }
  0xe1   : > { %v476_v42 = vadd.f32 %v960_v24, %v475_v40  ;;  %v496_v43 = vadd.f32 %v960_v24, %v495_v41  ;;  %v437_v44 = vpop.f32.mrf.mxu0  ;;  %v457_v45 = vpop.f32.mrf.mxu1 }
  0xe2   : > { %v438_v46 = vadd.f32 %v960_v24, %v437_v44  ;;  %v458_v47 = vadd.f32 %v960_v24, %v457_v45 }
  0xe3   : > { %v522_v48 = vmax.f32 %v476_v42, 0.0  ;;  %v530_v49 = vmax.f32 %v496_v43, 0.0 }
  0xe4   : > { %v507_v50 = vmax.f32 %v438_v46, 0.0  ;;  %v515_v51 = vmax.f32 %v458_v47, 0.0 }
  0xe5   : > { %555 = vst.msk [vmem:[%s968_s18 + $0xb0] sm:$0xff] %vm532_vm0, %v522_v48 }
  0xe6   : > { %563 = vst.msk [vmem:[%s968_s18 + $0xf0] sm:$0xff] %vm532_vm0, %v530_v49 }
  0xe7   : > { %540 = vst.msk [vmem:[%s968_s18 + $0x38] sm:$0xff] %vm532_vm0, %v507_v50 }
  0xe8   : > { %548 = vst.msk [vmem:[%s968_s18 + $0x78] sm:$0xff] %vm532_vm0, %v515_v51  ;;  %v477_v52 = vpop.f32.mrf.mxu2  ;;  %v497_v53 = vpop.f32.mrf.mxu3 }
  0xe9   : > { %v478_v54 = vadd.f32 %v960_v24, %v477_v52  ;;  %v498_v55 = vadd.f32 %v960_v24, %v497_v53 }
  0xeb   : > { %v523_v56 = vmax.f32 %v478_v54, 0.0  ;;  %v531_v57 = vmax.f32 %v498_v55, 0.0 }
  0xed   : > { %556 = vst.msk [vmem:[%s968_s18 + $0xb8] sm:$0xff] %vm532_vm0, %v523_v56 }
  0xee   : > { %564 = vst.msk [vmem:[%s968_s18 + $0xf8] sm:$0xff] %vm532_vm0, %v531_v57 }
  0xef PF: > { %s13_s14 = sadd.s32 1, %s865_s14   ;;  %s1077_s12 = smov %s861_s13 }
  0xf0   : > { %p10_p5 = scmp.ge.s32.totalorder %s13_s14, 4   ;;  %s1078_s13 = smov %s1080_s15 }
  0xf2   :  { %12 = sbr.rel (!%p10_p5) target bundleno = 2 (0x2), region = 62 }

</bundles_post_ra>
